<compile_context>
chip_gen: v5e
topology: v5e:2x2
jax: 0.10.0
libtpu: 0.0.40
codegen_flags: <defaults>
</compile_context>

<pallas_src>
import functools

import jax
import jax.numpy as jnp
from jax import lax
from jax.experimental import pallas as pl
from jax.experimental.pallas import tpu as pltpu


# ----------------------------------------------------------------------------
# Pallas kernel: fused upsample + concat + pad + 3x3 conv (BN folded) + ReLU.
# One grid step == `NB` batch elements (whole batch by default).
# ----------------------------------------------------------------------------
def _decoder_block_kernel(x2_ref, x1_ref, uk_ref, w_ref, b_ref, o_ref,
                          xe_ref, taps_ref, *, C1, C2, Cp, H, W, NB, P):
    # x2_ref : (NB*C2, H*W)      bf16 skip connection, flattened spatial
    # x1_ref : (NB*C1, H1*W1)    bf16 low-res feature, flattened spatial
    # uk_ref : (H1*W1, H*W)      bf16 bilinear-2x operator (Kronecker form)
    # w_ref  : (C_out, 9*Cp)     bf16 BN-folded conv weights, (kh, kw, ci) order
    # b_ref  : (C_out, 1)        f32 BN-folded bias
    # o_ref  : (C_out, NB*H*W)   f32 lane-dense output block
    # xe_ref : (NB*Cp, H*W+2P)   f32 VMEM scratch (zero margins = H-pad)
    # taps_ref: (9*Cp, NB*H*W)   f32 VMEM scratch holding the im2col taps
    HW = H * W
    C_in = C1 + C2

    # 0) Zero only the pad margins (interior rows [0:C_in] are fully rewritten
    #    below).  Per-step and cheap -> safe under "parallel" grid semantics.
    xe_ref[:, 0:P] = jnp.zeros((NB * Cp, P), jnp.float32)
    xe_ref[:, P + HW:P + HW + P] = jnp.zeros((NB * Cp, P), jnp.float32)
    if Cp > C_in:  # padded channel rows feed zero weights; keep them NaN-free
        for n in range(NB):
            xe_ref[n * Cp + C_in:(n + 1) * Cp, P:P + HW] = jnp.zeros(
                (Cp - C_in, HW), jnp.float32)

    # 1) 2x bilinear upsample of all NB*C1 rows in ONE bf16 MXU dot (f32 acc).
    up = jnp.dot(x1_ref[...], uk_ref[...], preferred_element_type=jnp.float32)

    # 2) Assemble concat([x2, up(x1)]) per batch element into the extended
    #    scratch interior; the zero margins provide the conv's H-direction pad.
    x2_all = x2_ref[...].astype(jnp.float32)
    for n in range(NB):
        r0 = n * Cp
        xe_ref[r0:r0 + C2, P:P + HW] = x2_all[n * C2:(n + 1) * C2, :]
        xe_ref[r0 + C2:r0 + C_in, P:P + HW] = up[n * C1:(n + 1) * C1, :]

    # 3) W-direction zero-pad masks (kill taps that wrapped across a row
    #    boundary in flattened coords).  Power-of-two W -> cheap & instead of %.
    col = lax.broadcasted_iota(jnp.int32, (Cp, HW), 1)
    col = (col & (W - 1)) if (W & (W - 1)) == 0 else (col % W)
    left_ok = col >= 1          # tap at w-1 invalid when w == 0
    right_ok = col <= W - 2     # tap at w+1 invalid when w == W-1

    # 4) im2col: write the 9 shifted/masked slices of each batch element
    #    straight into the persistent taps scratch (aligned stores), instead of
    #    concatenating SSA slices.
    t = 0
    for dh in (-1, 0, 1):
        for dw in (-1, 0, 1):
            start = P + dh * W + dw          # static slice start
            for n in range(NB):
                tap = xe_ref[n * Cp:(n + 1) * Cp, start:start + HW]
                if dw == -1:
                    tap = jnp.where(left_ok, tap, 0.0)
                elif dw == 1:
                    tap = jnp.where(right_ok, tap, 0.0)
                taps_ref[t * Cp:(t + 1) * Cp, n * HW:(n + 1) * HW] = tap
            t += 1

    # 5) 3x3 conv + folded BN as ONE bf16 MXU dot over all output channels and
    #    all batch elements, then f32 bias + ReLU epilogue, lane-dense store.
    acc = jnp.dot(w_ref[...], taps_ref[...].astype(jnp.bfloat16),
                  preferred_element_type=jnp.float32)
    o_ref[...] = jnp.maximum(acc + b_ref[...], 0.0)


# ----------------------------------------------------------------------------
# 1-D bilinear 2x operator (align_corners=False, replicate-clamped), as a
# dense (n_out, n_in) matrix.  Weights (1.0 / 0.75 / 0.25) are bf16-exact.
# ----------------------------------------------------------------------------
def _upsample_matrix(n_in, n_out):
    scale = n_in / n_out
    dst = jnp.arange(n_out, dtype=jnp.float32)
    src = jnp.maximum(dst * scale + 0.5 * scale - 0.5, 0.0)
    i0 = jnp.minimum(jnp.floor(src).astype(jnp.int32), n_in - 1)
    i1 = jnp.minimum(i0 + 1, n_in - 1)
    w1 = src - i0.astype(jnp.float32)
    w0 = 1.0 - w1
    return (w0[:, None] * jax.nn.one_hot(i0, n_in, dtype=jnp.float32)
            + w1[:, None] * jax.nn.one_hot(i1, n_in, dtype=jnp.float32))


# ----------------------------------------------------------------------------
# Decoder_Block forward (wrapper)
# ----------------------------------------------------------------------------
def decoder_block_forward(x1, x2, params, eps=1e-5, batch_tile=None):
    N, C1, H1, W1 = x1.shape
    N2, C2, H, W = x2.shape
    assert N2 == N and H == 2 * H1 and W == 2 * W1
    C_in = C1 + C2
    C_out = params["conv_w"].shape[0]
    K = 3
    HW = H * W
    HW1 = H1 * W1
    # Lane margin: >= W+1 (max im2col shift) and 128-aligned interior start.
    P = ((W + 1 + 127) // 128) * 128

    NB = N if batch_tile is None else batch_tile   # batch elems per grid step
    assert N % NB == 0
    grid = (N // NB,)

    # Fold inference-mode BatchNorm into the conv weights / bias.
    scale = params["gamma"] / jnp.sqrt(params["running_var"] + eps)
    w_fused = params["conv_w"] * scale[:, None, None, None]   # (C_out, C_in, 3, 3)
    b_fused = (params["conv_b"] - params["running_mean"]) * scale + params["beta"]

    # Channel-pad so in-kernel tap rows stay sublane-tile (8) aligned; padded
    # input rows are zeroed in the scratch and carry zero weights here.
    Cp = ((C_in + 7) // 8) * 8
    w_perm = jnp.zeros((C_out, K, K, Cp), jnp.float32)
    w_perm = w_perm.at[:, :, :, :C_in].set(
        jnp.transpose(w_fused, (0, 2, 3, 1)).astype(jnp.float32))
    w_flat = w_perm.reshape(C_out, K * K * Cp).astype(jnp.bfloat16)
    b_col = b_fused.astype(jnp.float32).reshape(C_out, 1)

    # Fixed bilinear-2x operator in flattened (Kronecker) form:
    # up_flat = x1_flat @ uk.   (bf16-exact weights)
    uh = _upsample_matrix(H1, H)                    # (H, H1)
    uw = _upsample_matrix(W1, W)                    # (W, W1)
    uk = jnp.kron(uh, uw).T.astype(jnp.bfloat16)    # (H1*W1, H*W)

    # Free (metadata) reshapes to lane-dense flattened-spatial, batch-major rows.
    x2_2d = x2.reshape(N * C2, HW).astype(jnp.bfloat16)
    x1_2d = x1.reshape(N * C1, HW1).astype(jnp.bfloat16)

    kernel = functools.partial(_decoder_block_kernel, C1=C1, C2=C2, Cp=Cp,
                               H=H, W=W, NB=NB, P=P)

    out_flat = pl.pallas_call(
        kernel,
        out_shape=jax.ShapeDtypeStruct((C_out, N * HW), jnp.float32),
        grid=grid,
        in_specs=[
            pl.BlockSpec((NB * C2, HW), lambda n: (n, 0)),
            pl.BlockSpec((NB * C1, HW1), lambda n: (n, 0)),
            pl.BlockSpec((HW1, HW), lambda n: (0, 0)),
            pl.BlockSpec((C_out, K * K * Cp), lambda n: (0, 0)),
            pl.BlockSpec((C_out, 1), lambda n: (0, 0)),
        ],
        out_specs=pl.BlockSpec((C_out, NB * HW), lambda n: (0, n)),
        scratch_shapes=[
            pltpu.VMEM((NB * Cp, HW + 2 * P), jnp.float32),   # extended image
            pltpu.VMEM((K * K * Cp, NB * HW), jnp.float32),   # im2col taps
        ],
        compiler_params=pltpu.CompilerParams(
            dimension_semantics=("parallel",),
            vmem_limit_bytes=64 * 1024 * 1024),
    )(x2_2d, x1_2d, uk, w_flat, b_col)

    # Columns are batch-major: (C_out, N, H, W) -> (N, C_out, H, W).
    return out_flat.reshape(C_out, N, H, W).transpose(1, 0, 2, 3)


# ----------------------------------------------------------------------------
# Pure-JAX reference (gather-based upsample + lax.conv) for sanity checking.
# ----------------------------------------------------------------------------
def bilinear_upsample_2x(x):
    _, _, H, W = x.shape

    def idx_w(n_in, n_out):
        dst = jnp.arange(n_out, dtype=jnp.float32)
        src = jnp.maximum(dst * (n_in / n_out) + 0.5 * (n_in / n_out) - 0.5, 0.0)
        i0 = jnp.minimum(jnp.floor(src).astype(jnp.int32), n_in - 1)
        i1 = jnp.minimum(i0 + 1, n_in - 1)
        w1 = src - i0.astype(jnp.float32)
        return i0, i1, 1.0 - w1, w1

    i0h, i1h, w0h, w1h = idx_w(H, 2 * H)
    i0w, i1w, w0w, w1w = idx_w(W, 2 * W)

    xr = (x[:, :, i0h, :] * w0h[None, None, :, None]
          + x[:, :, i1h, :] * w1h[None, None, :, None])
    return (xr[:, :, :, i0w] * w0w[None, None, None, :]
            + xr[:, :, :, i1w] * w1w[None, None, None, :])


def decoder_block_reference(x1, x2, params, eps=1e-5):
    up = bilinear_upsample_2x(x1)
    x_cat = jnp.concatenate([x2, up], axis=1)
    y = lax.conv_general_dilated(
        x_cat, params["conv_w"], window_strides=(1, 1),
        padding=((1, 1), (1, 1)),
        dimension_numbers=("NCHW", "OIHW", "NCHW"),
        precision=lax.Precision.HIGHEST)
    y = y + params["conv_b"][None, :, None, None]
    scale = params["gamma"] / jnp.sqrt(params["running_var"] + eps)
    y = ((y - params["running_mean"][None, :, None, None])
         * scale[None, :, None, None] + params["beta"][None, :, None, None])
    return jnp.maximum(y, 0.0)


if __name__ == "__main__":
    # x1: low-res decoder feature (upsampled 2x), x2: skip connection.
    N, C1, C2 = 2, 4, 4          # in_channels = C1 + C2 = 8
    H1, W1 = 8, 8                # x1 spatial; x2 is (2*H1, 2*W1) = 16x16
    C_out = 4

    key = jax.random.PRNGKey(0)
    k_x1, k_x2, k_w, k_b, k_g, k_be, k_rm, k_rv = jax.random.split(key, 8)

    x1 = jax.random.normal(k_x1, (N, C1, H1, W1), dtype=jnp.float32)
    x2 = jax.random.normal(k_x2, (N, C2, 2 * H1, 2 * W1), dtype=jnp.float32)

    C_in = C1 + C2
    params = {
        "conv_w": 0.1 * jax.random.normal(k_w, (C_out, C_in, 3, 3), jnp.float32),
        "conv_b": 0.1 * jax.random.normal(k_b, (C_out,), jnp.float32),
        "gamma": 1.0 + 0.1 * jax.random.normal(k_g, (C_out,), jnp.float32),
        "beta": 0.1 * jax.random.normal(k_be, (C_out,), jnp.float32),
        "running_mean": 0.1 * jax.random.normal(k_rm, (C_out,), jnp.float32),
        "running_var": jax.random.uniform(k_rv, (C_out,), jnp.float32, 0.5, 1.5),
    }

    out = jax.block_until_ready(decoder_block_forward(x1, x2, params))
    ref = jax.block_until_ready(decoder_block_reference(x1, x2, params))

    assert out.shape == (N, C_out, 2 * H1, 2 * W1)
    # bf16 MXU operands (f32 accumulation) vs f32 reference -> relaxed tolerance.
    assert jnp.allclose(out, ref, atol=5e-2, rtol=5e-2)

    print("KERNEL_OK")
</pallas_src>

<mosaic_0001>
module attributes {stable_mosaic.version = 11 : i64} {
  func.func @_decoder_block_kernel(%arg0: i32, %arg1: memref<8x256xbf16, #tpu.memory_space<vmem>>, %arg2: memref<8x64xbf16, #tpu.memory_space<vmem>>, %arg3: memref<64x256xbf16, #tpu.memory_space<vmem>>, %arg4: memref<4x72xbf16, #tpu.memory_space<vmem>>, %arg5: memref<4x1xf32, #tpu.memory_space<vmem>>, %arg6: memref<4x512xf32, #tpu.memory_space<vmem>>, %arg7: memref<16x512xf32, #tpu.memory_space<vmem>>, %arg8: memref<72x512xf32, #tpu.memory_space<vmem>>) attributes {dimension_semantics = [#tpu.dimension_semantics<parallel>], iteration_bounds = array<i64: 1>, scalar_prefetch = 0 : i64, scratch_operands = 2 : i64, tpu.core_type = #tpu.core_type<tc>, window_params = [{transform_indices = @transform_0, window_bounds = array<i64: 8, 256>}, {transform_indices = @transform_1, window_bounds = array<i64: 8, 64>}, {pipeline_mode = #tpu.pipeline_mode<synchronous>, transform_indices = @transform_2, window_bounds = array<i64: 64, 256>}, {pipeline_mode = #tpu.pipeline_mode<synchronous>, transform_indices = @transform_3, window_bounds = array<i64: 4, 72>}, {pipeline_mode = #tpu.pipeline_mode<synchronous>, transform_indices = @transform_4, window_bounds = array<i64: 4, 1>}, {transform_indices = @transform_5, window_bounds = array<i64: 4, 512>}]} {
    %cst = arith.constant 0.000000e+00 : f32
    %0 = vector.broadcast %cst : f32 to vector<16x128xf32>
    %c0 = arith.constant 0 : index
    %c0_0 = arith.constant 0 : index
    %1 = vector.load %arg7[%c0, %c0_0] : memref<16x512xf32, #tpu.memory_space<vmem>>, vector<16x128xf32>
    tpu.vector_store %arg7[%c0, %c0_0], %0 {strides = array<i32>} : memref<16x512xf32, #tpu.memory_space<vmem>>, vector<16x128xf32>,
    %cst_1 = arith.constant 0.000000e+00 : f32
    %2 = vector.broadcast %cst_1 : f32 to vector<16x128xf32>
    %c0_2 = arith.constant 0 : index
    %c384 = arith.constant 384 : index
    %3 = vector.load %arg7[%c0_2, %c384] : memref<16x512xf32, #tpu.memory_space<vmem>>, vector<16x128xf32>
    tpu.vector_store %arg7[%c0_2, %c384], %2 {strides = array<i32>} : memref<16x512xf32, #tpu.memory_space<vmem>>, vector<16x128xf32>,
    %c0_3 = arith.constant 0 : index
    %c0_4 = arith.constant 0 : index
    %4 = vector.load %arg2[%c0_3, %c0_4] : memref<8x64xbf16, #tpu.memory_space<vmem>>, vector<8x64xbf16>
    %c0_5 = arith.constant 0 : index
    %c0_6 = arith.constant 0 : index
    %5 = vector.load %arg3[%c0_5, %c0_6] : memref<64x256xbf16, #tpu.memory_space<vmem>>, vector<64x256xbf16>
    %cst_7 = arith.constant dense<0.000000e+00> : vector<8x256xf32>
    %6 = tpu.matmul %4, %5, %cst_7 {dimension_numbers = #tpu.dot_dimension_numbers<[1], [0], [0], [1], [0, 0, 1, 1], [], []>} : vector<8x64xbf16>, vector<64x256xbf16>, vector<8x256xf32> -> vector<8x256xf32>
    %c0_8 = arith.constant 0 : index
    %c0_9 = arith.constant 0 : index
    %7 = vector.load %arg1[%c0_8, %c0_9] : memref<8x256xbf16, #tpu.memory_space<vmem>>, vector<8x256xbf16>
    %8 = arith.extf %7 : vector<8x256xbf16> to vector<8x256xf32>
    %9 = vector.extract_strided_slice %8 {offsets = [0, 0], sizes = [4, 256], strides = [1, 1]} : vector<8x256xf32> to vector<4x256xf32>
    %c0_10 = arith.constant 0 : index
    %c128 = arith.constant 128 : index
    %10 = vector.load %arg7[%c0_10, %c128] : memref<16x512xf32, #tpu.memory_space<vmem>>, vector<4x256xf32>
    tpu.vector_store %arg7[%c0_10, %c128], %9 {strides = array<i32>} : memref<16x512xf32, #tpu.memory_space<vmem>>, vector<4x256xf32>,
    %11 = vector.extract_strided_slice %6 {offsets = [0, 0], sizes = [4, 256], strides = [1, 1]} : vector<8x256xf32> to vector<4x256xf32>
    %c4 = arith.constant 4 : index
    %c128_11 = arith.constant 128 : index
    %12 = vector.load %arg7[%c4, %c128_11] : memref<16x512xf32, #tpu.memory_space<vmem>>, vector<4x256xf32>
    tpu.vector_store %arg7[%c4, %c128_11], %11 {strides = array<i32>} : memref<16x512xf32, #tpu.memory_space<vmem>>, vector<4x256xf32>,
    %13 = vector.extract_strided_slice %8 {offsets = [4, 0], sizes = [4, 256], strides = [1, 1]} : vector<8x256xf32> to vector<4x256xf32>
    %c8 = arith.constant 8 : index
    %c128_12 = arith.constant 128 : index
    %14 = vector.load %arg7[%c8, %c128_12] : memref<16x512xf32, #tpu.memory_space<vmem>>, vector<4x256xf32>
    tpu.vector_store %arg7[%c8, %c128_12], %13 {strides = array<i32>} : memref<16x512xf32, #tpu.memory_space<vmem>>, vector<4x256xf32>,
    %15 = vector.extract_strided_slice %6 {offsets = [4, 0], sizes = [4, 256], strides = [1, 1]} : vector<8x256xf32> to vector<4x256xf32>
    %c12 = arith.constant 12 : index
    %c128_13 = arith.constant 128 : index
    %16 = vector.load %arg7[%c12, %c128_13] : memref<16x512xf32, #tpu.memory_space<vmem>>, vector<4x256xf32>
    tpu.vector_store %arg7[%c12, %c128_13], %15 {strides = array<i32>} : memref<16x512xf32, #tpu.memory_space<vmem>>, vector<4x256xf32>,
    %17 = tpu.iota {dimensions = array<i32: 1>} : vector<8x256xi32>
    %c15_i32 = arith.constant 15 : i32
    %18 = vector.broadcast %c15_i32 : i32 to vector<8x256xi32>
    %19 = arith.andi %17, %18 : vector<8x256xi32>
    %c1_i32 = arith.constant 1 : i32
    %20 = vector.broadcast %c1_i32 : i32 to vector<8x256xi32>
    %21 = arith.cmpi sge, %19, %20 : vector<8x256xi32>
    %c14_i32 = arith.constant 14 : i32
    %22 = vector.broadcast %c14_i32 : i32 to vector<8x256xi32>
    %23 = arith.cmpi sle, %19, %22 : vector<8x256xi32>
    %c0_14 = arith.constant 0 : index
    %c111 = arith.constant 111 : index
    %24 = vector.load %arg7[%c0_14, %c111] : memref<16x512xf32, #tpu.memory_space<vmem>>, vector<8x256xf32>
    %cst_15 = arith.constant 0.000000e+00 : f32
    %25 = vector.broadcast %cst_15 : f32 to vector<8x256xf32>
    %26 = arith.select %21, %24, %25 : vector<8x256xi1>, vector<8x256xf32>
    %c0_16 = arith.constant 0 : index
    %c0_17 = arith.constant 0 : index
    %27 = vector.load %arg8[%c0_16, %c0_17] : memref<72x512xf32, #tpu.memory_space<vmem>>, vector<8x256xf32>
    tpu.vector_store %arg8[%c0_16, %c0_17], %26 {strides = array<i32>} : memref<72x512xf32, #tpu.memory_space<vmem>>, vector<8x256xf32>,
    %c8_18 = arith.constant 8 : index
    %c111_19 = arith.constant 111 : index
    %28 = vector.load %arg7[%c8_18, %c111_19] : memref<16x512xf32, #tpu.memory_space<vmem>>, vector<8x256xf32>
    %cst_20 = arith.constant 0.000000e+00 : f32
    %29 = vector.broadcast %cst_20 : f32 to vector<8x256xf32>
    %30 = arith.select %21, %28, %29 : vector<8x256xi1>, vector<8x256xf32>
    %c0_21 = arith.constant 0 : index
    %c256 = arith.constant 256 : index
    %31 = vector.load %arg8[%c0_21, %c256] : memref<72x512xf32, #tpu.memory_space<vmem>>, vector<8x256xf32>
    tpu.vector_store %arg8[%c0_21, %c256], %30 {strides = array<i32>} : memref<72x512xf32, #tpu.memory_space<vmem>>, vector<8x256xf32>,
    %c0_22 = arith.constant 0 : index
    %c112 = arith.constant 112 : index
    %32 = vector.load %arg7[%c0_22, %c112] : memref<16x512xf32, #tpu.memory_space<vmem>>, vector<8x256xf32>
    %c8_23 = arith.constant 8 : index
    %c0_24 = arith.constant 0 : index
    %33 = vector.load %arg8[%c8_23, %c0_24] : memref<72x512xf32, #tpu.memory_space<vmem>>, vector<8x256xf32>
    tpu.vector_store %arg8[%c8_23, %c0_24], %32 {strides = array<i32>} : memref<72x512xf32, #tpu.memory_space<vmem>>, vector<8x256xf32>,
    %c8_25 = arith.constant 8 : index
    %c112_26 = arith.constant 112 : index
    %34 = vector.load %arg7[%c8_25, %c112_26] : memref<16x512xf32, #tpu.memory_space<vmem>>, vector<8x256xf32>
    %c8_27 = arith.constant 8 : index
    %c256_28 = arith.constant 256 : index
    %35 = vector.load %arg8[%c8_27, %c256_28] : memref<72x512xf32, #tpu.memory_space<vmem>>, vector<8x256xf32>
    tpu.vector_store %arg8[%c8_27, %c256_28], %34 {strides = array<i32>} : memref<72x512xf32, #tpu.memory_space<vmem>>, vector<8x256xf32>,
    %c0_29 = arith.constant 0 : index
    %c113 = arith.constant 113 : index
    %36 = vector.load %arg7[%c0_29, %c113] : memref<16x512xf32, #tpu.memory_space<vmem>>, vector<8x256xf32>
    %cst_30 = arith.constant 0.000000e+00 : f32
    %37 = vector.broadcast %cst_30 : f32 to vector<8x256xf32>
    %38 = arith.select %23, %36, %37 : vector<8x256xi1>, vector<8x256xf32>
    %c16 = arith.constant 16 : index
    %c0_31 = arith.constant 0 : index
    %39 = vector.load %arg8[%c16, %c0_31] : memref<72x512xf32, #tpu.memory_space<vmem>>, vector<8x256xf32>
    tpu.vector_store %arg8[%c16, %c0_31], %38 {strides = array<i32>} : memref<72x512xf32, #tpu.memory_space<vmem>>, vector<8x256xf32>,
    %c8_32 = arith.constant 8 : index
    %c113_33 = arith.constant 113 : index
    %40 = vector.load %arg7[%c8_32, %c113_33] : memref<16x512xf32, #tpu.memory_space<vmem>>, vector<8x256xf32>
    %cst_34 = arith.constant 0.000000e+00 : f32
    %41 = vector.broadcast %cst_34 : f32 to vector<8x256xf32>
    %42 = arith.select %23, %40, %41 : vector<8x256xi1>, vector<8x256xf32>
    %c16_35 = arith.constant 16 : index
    %c256_36 = arith.constant 256 : index
    %43 = vector.load %arg8[%c16_35, %c256_36] : memref<72x512xf32, #tpu.memory_space<vmem>>, vector<8x256xf32>
    tpu.vector_store %arg8[%c16_35, %c256_36], %42 {strides = array<i32>} : memref<72x512xf32, #tpu.memory_space<vmem>>, vector<8x256xf32>,
    %c0_37 = arith.constant 0 : index
    %c127 = arith.constant 127 : index
    %44 = vector.load %arg7[%c0_37, %c127] : memref<16x512xf32, #tpu.memory_space<vmem>>, vector<8x256xf32>
    %cst_38 = arith.constant 0.000000e+00 : f32
    %45 = vector.broadcast %cst_38 : f32 to vector<8x256xf32>
    %46 = arith.select %21, %44, %45 : vector<8x256xi1>, vector<8x256xf32>
    %c24 = arith.constant 24 : index
    %c0_39 = arith.constant 0 : index
    %47 = vector.load %arg8[%c24, %c0_39] : memref<72x512xf32, #tpu.memory_space<vmem>>, vector<8x256xf32>
    tpu.vector_store %arg8[%c24, %c0_39], %46 {strides = array<i32>} : memref<72x512xf32, #tpu.memory_space<vmem>>, vector<8x256xf32>,
    %c8_40 = arith.constant 8 : index
    %c127_41 = arith.constant 127 : index
    %48 = vector.load %arg7[%c8_40, %c127_41] : memref<16x512xf32, #tpu.memory_space<vmem>>, vector<8x256xf32>
    %cst_42 = arith.constant 0.000000e+00 : f32
    %49 = vector.broadcast %cst_42 : f32 to vector<8x256xf32>
    %50 = arith.select %21, %48, %49 : vector<8x256xi1>, vector<8x256xf32>
    %c24_43 = arith.constant 24 : index
    %c256_44 = arith.constant 256 : index
    %51 = vector.load %arg8[%c24_43, %c256_44] : memref<72x512xf32, #tpu.memory_space<vmem>>, vector<8x256xf32>
    tpu.vector_store %arg8[%c24_43, %c256_44], %50 {strides = array<i32>} : memref<72x512xf32, #tpu.memory_space<vmem>>, vector<8x256xf32>,
    %c0_45 = arith.constant 0 : index
    %c128_46 = arith.constant 128 : index
    %52 = vector.load %arg7[%c0_45, %c128_46] : memref<16x512xf32, #tpu.memory_space<vmem>>, vector<8x256xf32>
    %c32 = arith.constant 32 : index
    %c0_47 = arith.constant 0 : index
    %53 = vector.load %arg8[%c32, %c0_47] : memref<72x512xf32, #tpu.memory_space<vmem>>, vector<8x256xf32>
    tpu.vector_store %arg8[%c32, %c0_47], %52 {strides = array<i32>} : memref<72x512xf32, #tpu.memory_space<vmem>>, vector<8x256xf32>,
    %c8_48 = arith.constant 8 : index
    %c128_49 = arith.constant 128 : index
    %54 = vector.load %arg7[%c8_48, %c128_49] : memref<16x512xf32, #tpu.memory_space<vmem>>, vector<8x256xf32>
    %c32_50 = arith.constant 32 : index
    %c256_51 = arith.constant 256 : index
    %55 = vector.load %arg8[%c32_50, %c256_51] : memref<72x512xf32, #tpu.memory_space<vmem>>, vector<8x256xf32>
    tpu.vector_store %arg8[%c32_50, %c256_51], %54 {strides = array<i32>} : memref<72x512xf32, #tpu.memory_space<vmem>>, vector<8x256xf32>,
    %c0_52 = arith.constant 0 : index
    %c129 = arith.constant 129 : index
    %56 = vector.load %arg7[%c0_52, %c129] : memref<16x512xf32, #tpu.memory_space<vmem>>, vector<8x256xf32>
    %cst_53 = arith.constant 0.000000e+00 : f32
    %57 = vector.broadcast %cst_53 : f32 to vector<8x256xf32>
    %58 = arith.select %23, %56, %57 : vector<8x256xi1>, vector<8x256xf32>
    %c40 = arith.constant 40 : index
    %c0_54 = arith.constant 0 : index
    %59 = vector.load %arg8[%c40, %c0_54] : memref<72x512xf32, #tpu.memory_space<vmem>>, vector<8x256xf32>
    tpu.vector_store %arg8[%c40, %c0_54], %58 {strides = array<i32>} : memref<72x512xf32, #tpu.memory_space<vmem>>, vector<8x256xf32>,
    %c8_55 = arith.constant 8 : index
    %c129_56 = arith.constant 129 : index
    %60 = vector.load %arg7[%c8_55, %c129_56] : memref<16x512xf32, #tpu.memory_space<vmem>>, vector<8x256xf32>
    %cst_57 = arith.constant 0.000000e+00 : f32
    %61 = vector.broadcast %cst_57 : f32 to vector<8x256xf32>
    %62 = arith.select %23, %60, %61 : vector<8x256xi1>, vector<8x256xf32>
    %c40_58 = arith.constant 40 : index
    %c256_59 = arith.constant 256 : index
    %63 = vector.load %arg8[%c40_58, %c256_59] : memref<72x512xf32, #tpu.memory_space<vmem>>, vector<8x256xf32>
    tpu.vector_store %arg8[%c40_58, %c256_59], %62 {strides = array<i32>} : memref<72x512xf32, #tpu.memory_space<vmem>>, vector<8x256xf32>,
    %c0_60 = arith.constant 0 : index
    %c143 = arith.constant 143 : index
    %64 = vector.load %arg7[%c0_60, %c143] : memref<16x512xf32, #tpu.memory_space<vmem>>, vector<8x256xf32>
    %cst_61 = arith.constant 0.000000e+00 : f32
    %65 = vector.broadcast %cst_61 : f32 to vector<8x256xf32>
    %66 = arith.select %21, %64, %65 : vector<8x256xi1>, vector<8x256xf32>
    %c48 = arith.constant 48 : index
    %c0_62 = arith.constant 0 : index
    %67 = vector.load %arg8[%c48, %c0_62] : memref<72x512xf32, #tpu.memory_space<vmem>>, vector<8x256xf32>
    tpu.vector_store %arg8[%c48, %c0_62], %66 {strides = array<i32>} : memref<72x512xf32, #tpu.memory_space<vmem>>, vector<8x256xf32>,
    %c8_63 = arith.constant 8 : index
    %c143_64 = arith.constant 143 : index
    %68 = vector.load %arg7[%c8_63, %c143_64] : memref<16x512xf32, #tpu.memory_space<vmem>>, vector<8x256xf32>
    %cst_65 = arith.constant 0.000000e+00 : f32
    %69 = vector.broadcast %cst_65 : f32 to vector<8x256xf32>
    %70 = arith.select %21, %68, %69 : vector<8x256xi1>, vector<8x256xf32>
    %c48_66 = arith.constant 48 : index
    %c256_67 = arith.constant 256 : index
    %71 = vector.load %arg8[%c48_66, %c256_67] : memref<72x512xf32, #tpu.memory_space<vmem>>, vector<8x256xf32>
    tpu.vector_store %arg8[%c48_66, %c256_67], %70 {strides = array<i32>} : memref<72x512xf32, #tpu.memory_space<vmem>>, vector<8x256xf32>,
    %c0_68 = arith.constant 0 : index
    %c144 = arith.constant 144 : index
    %72 = vector.load %arg7[%c0_68, %c144] : memref<16x512xf32, #tpu.memory_space<vmem>>, vector<8x256xf32>
    %c56 = arith.constant 56 : index
    %c0_69 = arith.constant 0 : index
    %73 = vector.load %arg8[%c56, %c0_69] : memref<72x512xf32, #tpu.memory_space<vmem>>, vector<8x256xf32>
    tpu.vector_store %arg8[%c56, %c0_69], %72 {strides = array<i32>} : memref<72x512xf32, #tpu.memory_space<vmem>>, vector<8x256xf32>,
    %c8_70 = arith.constant 8 : index
    %c144_71 = arith.constant 144 : index
    %74 = vector.load %arg7[%c8_70, %c144_71] : memref<16x512xf32, #tpu.memory_space<vmem>>, vector<8x256xf32>
    %c56_72 = arith.constant 56 : index
    %c256_73 = arith.constant 256 : index
    %75 = vector.load %arg8[%c56_72, %c256_73] : memref<72x512xf32, #tpu.memory_space<vmem>>, vector<8x256xf32>
    tpu.vector_store %arg8[%c56_72, %c256_73], %74 {strides = array<i32>} : memref<72x512xf32, #tpu.memory_space<vmem>>, vector<8x256xf32>,
    %c0_74 = arith.constant 0 : index
    %c145 = arith.constant 145 : index
    %76 = vector.load %arg7[%c0_74, %c145] : memref<16x512xf32, #tpu.memory_space<vmem>>, vector<8x256xf32>
    %cst_75 = arith.constant 0.000000e+00 : f32
    %77 = vector.broadcast %cst_75 : f32 to vector<8x256xf32>
    %78 = arith.select %23, %76, %77 : vector<8x256xi1>, vector<8x256xf32>
    %c64 = arith.constant 64 : index
    %c0_76 = arith.constant 0 : index
    %79 = vector.load %arg8[%c64, %c0_76] : memref<72x512xf32, #tpu.memory_space<vmem>>, vector<8x256xf32>
    tpu.vector_store %arg8[%c64, %c0_76], %78 {strides = array<i32>} : memref<72x512xf32, #tpu.memory_space<vmem>>, vector<8x256xf32>,
    %c8_77 = arith.constant 8 : index
    %c145_78 = arith.constant 145 : index
    %80 = vector.load %arg7[%c8_77, %c145_78] : memref<16x512xf32, #tpu.memory_space<vmem>>, vector<8x256xf32>
    %cst_79 = arith.constant 0.000000e+00 : f32
    %81 = vector.broadcast %cst_79 : f32 to vector<8x256xf32>
    %82 = arith.select %23, %80, %81 : vector<8x256xi1>, vector<8x256xf32>
    %c64_80 = arith.constant 64 : index
    %c256_81 = arith.constant 256 : index
    %83 = vector.load %arg8[%c64_80, %c256_81] : memref<72x512xf32, #tpu.memory_space<vmem>>, vector<8x256xf32>
    tpu.vector_store %arg8[%c64_80, %c256_81], %82 {strides = array<i32>} : memref<72x512xf32, #tpu.memory_space<vmem>>, vector<8x256xf32>,
    %c0_82 = arith.constant 0 : index
    %c0_83 = arith.constant 0 : index
    %84 = vector.load %arg4[%c0_82, %c0_83] : memref<4x72xbf16, #tpu.memory_space<vmem>>, vector<4x72xbf16>
    %c0_84 = arith.constant 0 : index
    %c0_85 = arith.constant 0 : index
    %85 = vector.load %arg8[%c0_84, %c0_85] : memref<72x512xf32, #tpu.memory_space<vmem>>, vector<72x512xf32>
    %86 = arith.truncf %85 : vector<72x512xf32> to vector<72x512xbf16>
    %cst_86 = arith.constant dense<0.000000e+00> : vector<4x512xf32>
    %87 = tpu.matmul %84, %86, %cst_86 {dimension_numbers = #tpu.dot_dimension_numbers<[1], [0], [0], [1], [0, 0, 1, 1], [], []>} : vector<4x72xbf16>, vector<72x512xbf16>, vector<4x512xf32> -> vector<4x512xf32>
    %c0_87 = arith.constant 0 : index
    %c0_88 = arith.constant 0 : index
    %88 = vector.load %arg5[%c0_87, %c0_88] : memref<4x1xf32, #tpu.memory_space<vmem>>, vector<4x1xf32>
    %89 = vector.broadcast %88 : vector<4x1xf32> to vector<4x512xf32>
    %90 = arith.addf %87, %89 : vector<4x512xf32>
    %cst_89 = arith.constant 0.000000e+00 : f32
    %91 = vector.broadcast %cst_89 : f32 to vector<4x512xf32>
    %92 = arith.maximumf %90, %91 : vector<4x512xf32>
    %c0_90 = arith.constant 0 : index
    %c0_91 = arith.constant 0 : index
    %93 = vector.load %arg6[%c0_90, %c0_91] : memref<4x512xf32, #tpu.memory_space<vmem>>, vector<4x512xf32>
    tpu.vector_store %arg6[%c0_90, %c0_91], %92 {strides = array<i32>} : memref<4x512xf32, #tpu.memory_space<vmem>>, vector<4x512xf32>,
    return
  }
  func.func @transform_0(%arg0: i32) -> (i32, i32) {
    %c0_i32 = arith.constant 0 : i32
    %c0_i32_0 = arith.constant 0 : i32
    return %arg0, %c0_i32 : i32, i32
  }
  func.func @transform_1(%arg0: i32) -> (i32, i32) {
    %c0_i32 = arith.constant 0 : i32
    %c0_i32_0 = arith.constant 0 : i32
    return %arg0, %c0_i32 : i32, i32
  }
  func.func @transform_2(%arg0: i32) -> (i32, i32) {
    %c0_i32 = arith.constant 0 : i32
    %c0_i32_0 = arith.constant 0 : i32
    %c0_i32_1 = arith.constant 0 : i32
    return %c0_i32, %c0_i32_0 : i32, i32
  }
  func.func @transform_3(%arg0: i32) -> (i32, i32) {
    %c0_i32 = arith.constant 0 : i32
    %c0_i32_0 = arith.constant 0 : i32
    %c0_i32_1 = arith.constant 0 : i32
    return %c0_i32, %c0_i32_0 : i32, i32
  }
  func.func @transform_4(%arg0: i32) -> (i32, i32) {
    %c0_i32 = arith.constant 0 : i32
    %c0_i32_0 = arith.constant 0 : i32
    %c0_i32_1 = arith.constant 0 : i32
    return %c0_i32, %c0_i32_0 : i32, i32
  }
  func.func @transform_5(%arg0: i32) -> (i32, i32) {
    %c0_i32 = arith.constant 0 : i32
    %c0_i32_0 = arith.constant 0 : i32
    return %c0_i32, %arg0 : i32, i32
  }
}

</mosaic_0001>

<bundles_post_ra>
// kernel: tpu_custom_call.1
= control target key start
LH: loop header
LB: loop body
LE: loop exit
PB: predicated region body
PF: predicated region fallthrough
CT: control target
= control target key end

     0   :  { %10 = vsyncpa [#allocation5], 0  ;;  %s1292_s0 = inlined_call_operand.hbm [shape: bf16[8,256], index: 0, kind: input, shape index: {}]   ;;  %s1293_s1 = inlined_call_operand.vmem [shape: bf16[8,64], index: 1, kind: input, shape index: {}]   ;;  %s1294_s2 = inlined_call_operand.hbm [shape: bf16[64,256], index: 2, kind: input, shape index: {}]   ;;  %s1295_s3 = inlined_call_operand.hbm [shape: bf16[4,72], index: 3, kind: input, shape index: {}]   ;;  %s1296_s4 = inlined_call_operand.vmem [shape: f32[4,1], index: 4, kind: input, shape index: {}]   ;;  %s1297_s5 = inlined_call_operand.hbm [shape: f32[4,512], index: 5, kind: output, shape index: {}]  }
   0x1   :  { %11 = vsyncpa [#allocation8], 0  ;;  %s30_s20 = sshll.u32 %s1294_s2, 4  ;;  %s31_s20 = int_to_ptr.hbm [resolvable:$true] %s30_s20 }
   0x2   :  { %12 = vsyncpa [#allocation6], 0  ;;  %s1008_s21 = smov [#allocation7]   ;;  %s18_s25 = sshll.u32 %s1292_s0, 4  ;;  %s19_s25 = int_to_ptr.hbm [resolvable:$true] %s18_s25 }
   0x3   :  { %s32_s22 = sshll.u32 %s1008_s21, 4  ;;  %s1009_s26 = smov 128   ;;  %s33_s22 = int_to_ptr.vmem [resolvable:$true] %s32_s22 }
   0x4   :  { %s1010_s27 = smov 8   ;;  %s1011_s28 = smov [#allocation4]  }
   0x5   :  { %38 = dma.hbm_to_vmem [thread:$0]  %s31_s20, 1024, %s33_s22, [#allocation8], %s1009_s26, %s1009_s26, %s1010_s27  }
   0x6   :  { %s20_s29 = sshll.u32 %s1011_s28, 4  ;;  %s44_s7 = sshll.u32 %s1295_s3, 4  ;;  %s21_s29 = int_to_ptr.vmem [resolvable:$true] %s20_s29  ;;  %s45_s7 = int_to_ptr.hbm [resolvable:$true] %s44_s7 }
   0x7   :  { %23 = dma.hbm_to_vmem [thread:$0]  %s19_s25, 128, %s21_s29, [#allocation5]  }
   0x8   :  { %s1012_s2 = smov [#allocation9]  }
   0x9   :  { %s46_s8 = sshll.u32 %s1012_s2, 4  ;;  %s47_s8 = int_to_ptr.vmem [resolvable:$true] %s46_s8 }
   0xa   :  { %49 = dma.hbm_to_vmem [thread:$0]  %s45_s7, 32, %s47_s8, [#allocation8]  }
   0xb   :  { %1002 = dma.done.wait [#allocation5], 128  }
   0xc   :  { %1003 = vsyncadd [#allocation5], 4294967168 }
   0xd   :  { %1004 = dma.done.wait [#allocation8], 1056  }
   0xe   :  { %1005 = vsyncadd [#allocation8], 4294966240  ;;  %v700_v0 = vld [vmem:[#allocation7 + $0x30] sm:$0xf]  ;;  %v719_v1 = vld [vmem:[#allocation7 + $0x34] sm:$0xf0]  ;;  %v171_v53 = vlaneseq }
   0xf   :  { %v718_v2 = vld [vmem:[#allocation7 + $0x34] sm:$0xf]  ;;  %v701_v3 = vor.u32 %v719_v1, %v700_v0  ;;  %v702_v4 = vld [vmem:[#allocation7 + $0x38] sm:$0xf0]  ;;  %v692_v5 = vld [vmem:[#allocation7 + $0x20] sm:$0xf] }
  0x10   :  { %v717_v6 = vld [vmem:[#allocation7 + $0x24] sm:$0xf0]  ;;  %v705_v7 = vor.u32 %v718_v2, %v702_v4  ;;  %v716_v8 = vld [vmem:[#allocation7 + $0x24] sm:$0xf]  ;;  %v694_v9 = vld [vmem:[#allocation7 + $0x28] sm:$0xf0] }
  0x11   :  { %126 = vmatpush.bf16.msra.mxu0 %v701_v3  ;;  %v693_v10 = vor.u32 %v717_v6, %v692_v5  ;;  %v697_v11 = vor.u32 %v716_v8, %v694_v9  ;;  %v684_v12 = vld [vmem:[#allocation7 + $0x10] sm:$0xf]  ;;  %v715_v13 = vld [vmem:[#allocation7 + $0x14] sm:$0xf0]  ;;  %v714_v14 = vld [vmem:[#allocation7 + $0x14] sm:$0xf] }
  0x12   :  { %139 = vmatpush.bf16.msra.mxu1 %v705_v7  ;;  %v686_v15 = vld [vmem:[#allocation7 + $0x18] sm:$0xf0]  ;;  %v685_v16 = vor.u32 %v715_v13, %v684_v12  ;;  %v676_v18 = vld [vmem:[#allocation7] sm:$0xf]  ;;  %v713_v19 = vld [vmem:[#allocation7 + $0x4] sm:$0xf0] }
  0x13   :  { %v689_v17 = vor.u32 %v714_v14, %v686_v15  ;;  %v712_v20 = vld [vmem:[#allocation7 + $0x4] sm:$0xf]  ;;  %v678_v21 = vld [vmem:[#allocation7 + $0x8] sm:$0xf0]  ;;  %v677_v22 = vor.u32 %v713_v19, %v676_v18  ;;  %v69_v24 = vld [vmem:[%s1293_s1] sm:$0xf] }
  0x14   :  { %v681_v23 = vor.u32 %v712_v20, %v678_v21  ;;  %vm118_vm0 = vcmask 523264   ;;  %v148_v25 = vld [vmem:[#allocation4] sm:$0xff]  ;;  %v1013_v36 = vmov 0.0   ;;  %s1014_s1 = smov 111   ;;  %s1015_s9 = smov 112   ;;  %v1100_v54 = vand.u32 127, %v171_v53 }
  0x15   :  { %127 = vmatpush.bf16.msra.mxu0 %v693_v10  ;;  %v149_v26 = vunpack.c.l.bf16 %v148_v25  ;;  %v150_v27 = vunpack.c.h.bf16 %v148_v25  ;;  %s1016_s10 = smov 113   ;;  %s1017_s11 = smov 1   ;;  %vm479_vm1 = vcmask 908288   ;;  %vm575_vm3 = vcmask 1043456  }
  0x16   :  { %140 = vmatpush.bf16.msra.mxu1 %v697_v11  ;;  %s1018_s12 = smov 15   ;;  %s1019_s13 = smov 127   ;;  %v173_v58 = vadd.s32 128, %v1100_v54  ;;  %v174_v5 = vand.u32 15, %v1100_v54  ;;  %vm442_vm5 = vcmask 916480   ;;  %vm401_vm6 = vcmask 924672  }
  0x17   :  { %v163_v28 = vrot.slane %v149_v26, 4  ;;  %151 = vst [vmem:[#allocation2 + $0x20] sm:$0xf] %v149_v26  ;;  %v164_v29 = vrot.slane %v150_v27, 4  ;;  %s1020_s14 = smov 16   ;;  %s1021_s15 = smov 17  }
  0x18   :  { %152 = vst [vmem:[#allocation2 + $0x8] sm:$0xf] %v150_v27  ;;  %v175_v59 = vand.u32 15, %v173_v58  ;;  %vm1132_vm7 = vcmp.le.s32.totalorder %v174_v5, 14  ;;  %vm1022_vm8 = vmmov 1   ;;  %vm360_vm10 = vcmask 1039360  }
  0x19   :  { %128 = vmatpush.bf16.msra.mxu0 %v685_v16  ;;  %167 = vst [vmem:[#allocation2 + $0x10] sm:$0xf] %v163_v28  ;;  %vm1172_vm11 = vcmp.ge.s32.totalorder %v174_v5, 1  ;;  %vm723_vm14 = vmpackc.low %vm1132_vm7, %vm1022_vm8  ;;  %vm270_vm15 = vcmask 121856   ;;  %s663_s21 = sshll.u32 %s1297_s5, 4  ;;  %s664_s21 = int_to_ptr.hbm [resolvable:$true] %s663_s21 }
  0x1a   :  { %141 = vmatpush.bf16.msra.mxu1 %v689_v17  ;;  %168 = vst [vmem:[#allocation2 + $0x30] sm:$0xf] %v164_v29  ;;  %vm1111_vm2 = vcmp.le.s32.totalorder %v175_v59, 14  ;;  %vm1126_vm4 = vcmp.ge.s32.totalorder %v175_v59, 1  ;;  %vm1193_vm13 = vmpackc.low %vm1022_vm8, %vm1172_vm11 }
  0x1b   :  { %vm1143_vm9 = vmpackc.low %vm1022_vm8, %vm1126_vm4 }
  0x1c   :  { %vm1184_vm12 = vmpackc.low %vm1111_vm2, %vm1022_vm8  ;;  %vm233_vm8 = vcmask 130048  }
  0x1d   :  { %129 = vmatpush.bf16.msra.mxu0 %v677_v22 }
  0x1e   :  { %142 = vmatpush.bf16.msra.mxu1 %v681_v23 }
  0x20   :  { %706 = vmatmul.msk.bf16.vlgmr.msra.gmra.mxu0 %vm118_vm0, %v69_v24 }
  0x21   :  { %707 = vmatmul.msk.bf16.vlgmr.msra.gmra.mxu1 %vm118_vm0, %v69_v24  ;;  %vm311_vm0 = vcmask 7168  }
  0x9d   :  { %v131_v30 = vpop.f32.mrf.mxu0 }
  0x9e   :  { %v155_v31 = vrot.slane %v131_v30, 4  ;;  %169 = vst [vmem:[#allocation2 + $0x10] sm:$0xf0] %v131_v30  ;;  %v144_v32 = vpop.f32.mrf.mxu1 }
  0x9f   :  { %v156_v33 = vrot.slane %v144_v32, 4  ;;  %170 = vst [vmem:[#allocation2 + $0x30] sm:$0xf0] %v144_v32 }
  0xa0   :  { %159 = vst [vmem:[#allocation2 + $0x20] sm:$0xf0] %v155_v31 }
  0xa1   :  { %160 = vst [vmem:[#allocation2 + $0x8] sm:$0xf0] %v156_v33 }
  0xa5   :  { %v133_v34 = vpop.f32.mrf.mxu0  ;;  %v1067_v35 = vld [vmem:[#allocation2 + $0x10] sm:$0xff] }
  0xa6   :  { %v785_v37 = vpack.i.bf16 %v1067_v35, %v1013_v36  ;;  %v146_v38 = vpop.f32.mrf.mxu1  ;;  %v1072_v39 = vld [vmem:[#allocation2 + $0x30] sm:$0xff]  ;;  %v565_v36 = vld [vmem:[%s1296_s4] sm:$0xf]  ;;  %s1024_s4 = smov [#allocation10]  }
  0xa7   :  { %v825_v40 = vpack.i.bf16 0.0, %v1072_v39  ;;  %v1075_v41 = vld [vmem:[#allocation2 + $0x20] sm:$0xff]  ;;  %s661_s18 = sshll.u32 %s1024_s4, 4  ;;  %s662_s18 = int_to_ptr.vmem [resolvable:$true] %s661_s18 }
  0xa8   :  { %786 = vrot.lane.b32.xlu2 %v785_v37, %s1014_s1  ;;  %796 = vrot.lane.b32.xlu1 %v785_v37, %s1015_s9  ;;  %v1077_v42 = vld [vmem:[#allocation2 + $0x8] sm:$0xff]  ;;  %v850_v44 = vpack.i.bf16 %v1072_v39, %v1075_v41 }
  0xa9   :  { %791 = vrot.lane.b32.xlu0 %v785_v37, %s1016_s10  ;;  %v840_v43 = vpack.i.bf16 0.0, %v1077_v42  ;;  %v870_v45 = vpack.i.bf16 %v1077_v42, %v1075_v41 }
  0xb0   :  { %806 = vrot.lane.b32.xlu2 %v785_v37, %s1017_s11  ;;  %801 = vrot.lane.b32.xlu1 %v785_v37, %s1018_s12 }
  0xb1   :  { %811 = vrot.lane.b32.xlu0 %v785_v37, %s1019_s13 }
  0xb8   :  { %826 = vrot.lane.b32.xlu2 %v825_v40, %s1018_s12  ;;  %821 = vrot.lane.b32.xlu1 %v785_v37, %s1020_s14 }
  0xb9   :  { %816 = vrot.lane.b32.xlu0 %v785_v37, %s1021_s15 }
  0xc0   :  { %851 = vrot.lane.b32.xlu2 %v850_v44, %s1016_s10  ;;  %841 = vrot.lane.b32.xlu1 %v840_v43, %s1016_s10 }
  0xc1   :  { %831 = vrot.lane.b32.xlu0 %v840_v43, %s1014_s1 }
  0xc8   :  { %866 = vrot.lane.b32.xlu2 %v850_v44, %s1019_s13  ;;  %846 = vrot.lane.b32.xlu1 %v840_v43, %s1015_s9 }
  0xc9   :  { %836 = vrot.lane.b32.xlu0 %v850_v44, %s1014_s1 }
  0xd0   :  { %871 = vrot.lane.b32.xlu2 %v870_v45, %s1018_s12  ;;  %861 = vrot.lane.b32.xlu1 %v840_v43, %s1019_s13 }
  0xd1   :  { %856 = vrot.lane.b32.xlu0 %v850_v44, %s1015_s9  ;;  %v1023_v44 = vmov 0  }
  0xd2   :  { %905 = vset.pattern.permute.xlu0 %v1023_v44 }
  0xd8   :  { %891 = vrot.lane.b32.xlu2 %v870_v45, %s1020_s14  ;;  %886 = vrot.lane.b32.xlu1 %v870_v45, %s1021_s15 }
  0xd9   :  { %876 = vrot.lane.b32.xlu0 %v870_v45, %s1017_s11 }
  0xe0   :  { %901 = vrot.lane.b32.xlu2 %v825_v40, %s1020_s14  ;;  %896 = vrot.lane.b32.xlu1 %v825_v40, %s1021_s15 }
  0xe1   :  { %881 = vrot.lane.b32.xlu0 %v825_v40, %s1017_s11 }
  0xe9   :  { %568 = vperm.xlu0 %905, %v565_v36  }
 0x102   :  { %v787_v46 = vpop.permute.xlu2 %786 }
 0x103   :  { %v789_v11 = vunpack.i.h.bf16 %v787_v46  ;;  %v788_v15 = vunpack.i.l.bf16 %v787_v46 }
 0x10a   :  { %v1088_v47 = vpop.permute.xlu2 %806 }
 0x112   :  { %v1094_v50 = vpop.permute.xlu2 %826 }
 0x11a   :  { %v1090_v48 = vpop.permute.xlu1 %796  ;;  %v1104_v56 = vpop.permute.xlu2 %851 }
 0x11b   :  { %v1092_v49 = vpop.permute.xlu0 %791  ;;  %v854_v20 = vunpack.i.h.bf16 %v1104_v56  ;;  %v799_v37 = vunpack.i.h.bf16 %v1090_v48  ;;  %v798_v38 = vunpack.i.l.bf16 %v1090_v48  ;;  %v853_v43 = vunpack.i.l.bf16 %v1104_v56 }
 0x11c   :  { %v794_v19 = vunpack.i.h.bf16 %v1092_v49  ;;  %v793_v40 = vunpack.i.l.bf16 %v1092_v49 }
 0x11e   :  { %v422_v58 = vsel %vm401_vm6, %v794_v19, %v854_v20 }
 0x122   :  { %v1096_v51 = vpop.permute.xlu1 %801  ;;  %v1115_v1 = vpop.permute.xlu2 %866 }
 0x123   :  { %v1098_v52 = vpop.permute.xlu0 %811  ;;  %v869_v59 = vunpack.i.h.bf16 %v1115_v1 }
 0x124   :  { %v814_v56 = vunpack.i.h.bf16 %v1098_v52 }
 0x12a   :  { %v1102_v55 = vpop.permute.xlu1 %821  ;;  %v1150_v28 = vpop.permute.xlu2 %871 }
 0x12b   :  { %v1106_v57 = vpop.permute.xlu0 %816  ;;  %v874_v19 = vunpack.i.h.bf16 %v1150_v28 }
 0x132   :  { %v1109_v60 = vpop.permute.xlu1 %841 }
 0x133   :  { %v832_v61 = vpop.permute.xlu0 %831  ;;  %v844_v6 = vunpack.i.h.bf16 %v1109_v60  ;;  %v843_v7 = vunpack.i.l.bf16 %v1109_v60 }
 0x134   :  { %v834_v62 = vunpack.i.h.bf16 %v832_v61  ;;  %v833_v63 = vunpack.i.l.bf16 %v832_v61 }
 0x135   :  { %v403_v21 = vsel %vm401_vm6, %v843_v7, %v844_v6 }
 0x136   :  { %v481_v2 = vsel %vm479_vm1, %v833_v63, %v834_v62  ;;  %v813_v62 = vunpack.i.l.bf16 %v1098_v52 }
 0x137   :  { %v485_v3 = vsel %vm1111_vm2, %v481_v2, 0.0 }
 0x138   :  { %v562_v4 = vpack.c.bf16 %v485_v3, %v485_v3  ;;  %v868_v3 = vunpack.i.l.bf16 %v1115_v1 }
 0x13a   :  { %v1123_v8 = vpop.permute.xlu1 %846  ;;  %v580_v9 = vsel %vm575_vm3, %v562_v4, 0  ;;  %v402_v4 = vsel %vm401_vm6, %v853_v43, %v843_v7  ;;  %v823_v43 = vunpack.i.l.bf16 %v1102_v55 }
 0x13b   :  { %v849_v12 = vunpack.i.h.bf16 %v1123_v8  ;;  %v848_v13 = vunpack.i.l.bf16 %v1123_v8  ;;  %v837_v14 = vpop.permute.xlu0 %836  ;;  %604 = vmatpush.bf16.msra.mxu3 %v580_v9  ;;  %v423_v8 = vsel %vm401_vm6, %v854_v20, %v793_v40  ;;  %v892_v20 = vpop.permute.xlu2 %891  ;;  %vm738_vm6 = vmpackc.low %vm1126_vm4, %vm1111_vm2 }
 0x13c   :  { %v839_v16 = vunpack.i.h.bf16 %v837_v14  ;;  %v838_v17 = vunpack.i.l.bf16 %v837_v14 }
 0x13d   :  { %v444_v22 = vsel %vm442_vm5, %v848_v13, %v849_v12 }
 0x13e   :  { %v733_v24 = vpack.c.bf16 %v444_v22, %v403_v21  ;;  %v480_v25 = vsel %vm479_vm1, %v838_v17, %v833_v63  ;;  %v500_v26 = vsel %vm479_vm1, %v789_v11, %v839_v16  ;;  %v501_v27 = vsel %vm479_vm1, %v839_v16, %v788_v15  ;;  %vm726_vm1 = vmpackc.low %vm1172_vm11, %vm1132_vm7 }
 0x13f   :  { %v484_v29 = vsel %vm1132_vm7, %v480_v25, 0.0  ;;  %v504_v30 = vsel %vm1132_vm7, %v500_v26, 0.0  ;;  %v505_v31 = vsel %vm1111_vm2, %v501_v27, 0.0  ;;  %v381_v16 = vsel %vm360_vm10, %v814_v56, %v869_v59 }
 0x140   :  { %734 = vmatpush.bf16.msk.msra.mxu3 %vm1143_vm9, %v733_v24  ;;  %v561_v32 = vpack.c.bf16 %v484_v29, %v484_v29  ;;  %v563_v33 = vpack.c.bf16 %v504_v30, %v504_v30  ;;  %v564_v34 = vpack.c.bf16 %v505_v31, %v505_v31  ;;  %v382_v17 = vsel %vm360_vm10, %v869_v59, %v813_v62 }
 0x141   :  { %v808_v21 = vunpack.i.l.bf16 %v1088_v47  ;;  %v803_v22 = vunpack.i.l.bf16 %v1096_v51  ;;  %v748_v27 = vpack.c.bf16 %v381_v16, %v1067_v35 }
 0x142   :  { %v862_v45 = vpop.permute.xlu1 %861  ;;  %v577_v46 = vsel %vm575_vm3, %v561_v32, 0  ;;  %v583_v53 = vsel %vm575_vm3, %v563_v33, 0  ;;  %v586_v54 = vsel %vm575_vm3, %v564_v34, 0  ;;  %v818_v33 = vunpack.i.l.bf16 %v1106_v57 }
 0x143   :  { %v864_v60 = vunpack.i.h.bf16 %v862_v45  ;;  %v863_v48 = vunpack.i.l.bf16 %v862_v45  ;;  %v857_v61 = vpop.permute.xlu0 %856  ;;  %591 = vmatpush.bf16.msra.mxu2 %v577_v46  ;;  %617 = vmatpush.bf16.msrb.mxu0 %v583_v53  ;;  %v804_v46 = vunpack.i.h.bf16 %v1096_v51  ;;  %v809_v53 = vunpack.i.h.bf16 %v1088_v47  ;;  %v508_v47 = vld [vmem:[#allocation9] sm:$0x3] }
 0x144   :  { %v859_v63 = vunpack.i.h.bf16 %v857_v61  ;;  %v858_v2 = vunpack.i.l.bf16 %v857_v61  ;;  %630 = vmatpush.bf16.msrb.mxu1 %v586_v54  ;;  %v829_v51 = vunpack.i.h.bf16 %v1094_v50 }
 0x145   :  { %v362_v6 = vsel %vm360_vm10, %v863_v48, %v864_v60  ;;  %v828_v60 = vunpack.i.l.bf16 %v1094_v50 }
 0x146   :  { %v443_v52 = vsel %vm442_vm5, %v858_v2, %v848_v13  ;;  %v736_v7 = vpack.c.bf16 %v362_v6, %v1077_v42  ;;  %v461_v9 = vsel %vm442_vm5, %v799_v37, %v859_v63  ;;  %v462_v11 = vsel %vm442_vm5, %v859_v63, %v798_v38 }
 0x147   :  { %v721_v12 = vpack.c.bf16 %v443_v52, %v402_v4  ;;  %v745_v14 = vpack.c.bf16 %v461_v9, %v422_v58  ;;  %v757_v15 = vpack.c.bf16 %v462_v11, %v423_v8  ;;  %v361_v13 = vsel %vm360_vm10, %v868_v3, %v863_v48  ;;  %v902_v48 = vpop.permute.xlu2 %901 }
 0x148   :  { %737 = vmatpush.bf16.msk.msra.mxu3 %vm1184_vm12, %v736_v7  ;;  %v873_v42 = vunpack.i.l.bf16 %v1150_v28  ;;  %v724_v26 = vpack.c.bf16 %v361_v13, %v1075_v41  ;;  %v760_v28 = vpack.c.bf16 %v382_v17, %v1072_v39  ;;  %vm192_vm5 = vcmask 138240  }
 0x149   :  { %722 = vmatpush.bf16.msk.msra.mxu2 %vm1193_vm13, %v721_v12  ;;  %746 = vmatpush.bf16.msk.msrb.mxu0 %vm1193_vm13, %v745_v14  ;;  %v894_v39 = vunpack.i.h.bf16 %v892_v20  ;;  %v893_v41 = vunpack.i.l.bf16 %v892_v20  ;;  %v819_v6 = vunpack.i.h.bf16 %v1106_v57  ;;  %vm571_vm10 = vcmask 588800  }
 0x14a   :  { %758 = vmatpush.bf16.msk.msrb.mxu1 %vm1143_vm9, %v757_v15  ;;  %v887_v24 = vpop.permute.xlu1 %886  ;;  %v271_v34 = vsel %vm270_vm15, %v803_v22, %v873_v42  ;;  %v272_v35 = vsel %vm270_vm15, %v873_v42, %v874_v19  ;;  %v291_v50 = vsel %vm270_vm15, %v829_v51, %v804_v46  ;;  %v292_v5 = vsel %vm270_vm15, %v804_v46, %v828_v60 }
 0x14b   :  { %v877_v25 = vpop.permute.xlu0 %876  ;;  %v889_v29 = vunpack.i.h.bf16 %v887_v24  ;;  %v888_v30 = vunpack.i.l.bf16 %v887_v24  ;;  %v234_v58 = vsel %vm233_vm8, %v823_v43, %v893_v41  ;;  %v235_v59 = vsel %vm233_vm8, %v893_v41, %v894_v39 }
 0x14c   :  { %v879_v31 = vunpack.i.h.bf16 %v877_v25  ;;  %v878_v32 = vunpack.i.l.bf16 %v877_v25  ;;  %v904_v8 = vunpack.i.h.bf16 %v902_v48  ;;  %v903_v52 = vunpack.i.l.bf16 %v902_v48 }
 0x14d   :  { %725 = vmatpush.bf16.msk.msra.mxu2 %vm723_vm14, %v724_v26  ;;  %749 = vmatpush.bf16.msk.msrb.mxu0 %vm723_vm14, %v748_v27  ;;  %v193_v44 = vsel %vm192_vm5, %v818_v33, %v888_v30  ;;  %v194_v45 = vsel %vm192_vm5, %v888_v30, %v889_v29  ;;  %v824_v12 = vunpack.i.h.bf16 %v1102_v55 }
 0x14e   :  { %761 = vmatpush.bf16.msk.msrb.mxu1 %vm1184_vm12, %v760_v28  ;;  %v312_v36 = vsel %vm311_vm0, %v808_v21, %v878_v32  ;;  %v313_v37 = vsel %vm311_vm0, %v878_v32, %v879_v31  ;;  %v730_v56 = vpack.c.bf16 %v234_v58, %v193_v44  ;;  %v742_v62 = vpack.c.bf16 %v235_v59, %v194_v45 }
 0x14f   :  { %v727_v38 = vpack.c.bf16 %v312_v36, %v271_v34  ;;  %v739_v40 = vpack.c.bf16 %v313_v37, %v272_v35  ;;  %v252_v55 = vsel %vm233_vm8, %v904_v8, %v824_v12  ;;  %v253_v13 = vsel %vm233_vm8, %v824_v12, %v903_v52 }
 0x151   :  { %728 = vmatpush.bf16.msk.msra.mxu2 %vm726_vm1, %v727_v38  ;;  %740 = vmatpush.bf16.msk.msra.mxu3 %vm738_vm6, %v739_v40 }
 0x152   :  { %v897_v54 = vpop.permute.xlu1 %896 }
 0x153   :  { %v882_v61 = vpop.permute.xlu0 %881  ;;  %v899_v63 = vunpack.i.h.bf16 %v897_v54  ;;  %v898_v2 = vunpack.i.l.bf16 %v897_v54 }
 0x154   :  { %v884_v3 = vunpack.i.h.bf16 %v882_v61  ;;  %v883_v4 = vunpack.i.l.bf16 %v882_v61 }
 0x155   :  { %731 = vmatpush.bf16.msk.msra.mxu2 %vm1193_vm13, %v730_v56  ;;  %743 = vmatpush.bf16.msk.msra.mxu3 %vm1143_vm9, %v742_v62  ;;  %v213_v14 = vsel %vm192_vm5, %v899_v63, %v819_v6  ;;  %v214_v15 = vsel %vm192_vm5, %v819_v6, %v898_v2 }
 0x156   :  { %v332_v7 = vsel %vm311_vm0, %v884_v3, %v809_v53  ;;  %v333_v9 = vsel %vm311_vm0, %v809_v53, %v883_v4  ;;  %v754_v16 = vpack.c.bf16 %v252_v55, %v213_v14  ;;  %v766_v17 = vpack.c.bf16 %v253_v13, %v214_v15 }
 0x157   :  { %v751_v11 = vpack.c.bf16 %v332_v7, %v291_v50  ;;  %v763_v57 = vpack.c.bf16 %v333_v9, %v292_v5 }
 0x158   :  { %708 = vmatmul.msk.bf16.vlgmr.msra.gmra.mxu2 %vm571_vm10, %v508_v47  ;;  %709 = vmatmul.msk.bf16.vlgmr.msra.gmra.mxu3 %vm571_vm10, %v508_v47 }
 0x159   :  { %752 = vmatpush.bf16.msk.msrb.mxu0 %vm726_vm1, %v751_v11  ;;  %764 = vmatpush.bf16.msk.msrb.mxu1 %vm738_vm6, %v763_v57 }
 0x15b   :  { %v569_v10 = vpop.permute.xlu0 %568 }
 0x15d   :  { %755 = vmatpush.bf16.msk.msrb.mxu0 %vm1193_vm13, %v754_v16  ;;  %767 = vmatpush.bf16.msk.msrb.mxu1 %vm1143_vm9, %v766_v17 }
 0x160   :  { %710 = vmatmul.msk.bf16.vlgmr.msrb.gmra.mxu0 %vm571_vm10, %v508_v47  ;;  %711 = vmatmul.msk.bf16.vlgmr.msrb.gmra.mxu1 %vm571_vm10, %v508_v47 }
 0x1db   :  { %v597_v0 = vpop.f32.mrf.mxu2  ;;  %v610_v18 = vpop.f32.mrf.mxu3 }
 0x1dc   :  { %v598_v49 = vadd.f32 %v597_v0, %v569_v10  ;;  %v611_v19 = vadd.f32 %v610_v18, %v569_v10 }
 0x1dd   :  { %v623_v42 = vpop.f32.mrf.mxu0  ;;  %v636_v20 = vpop.f32.mrf.mxu1 }
 0x1de   :  { %v640_v21 = vmax.f32 %v598_v49, 0.0  ;;  %v641_v22 = vmax.f32 %v611_v19, 0.0  ;;  %v624_v24 = vadd.f32 %v623_v42, %v569_v10  ;;  %v637_v25 = vadd.f32 %v636_v20, %v569_v10 }
 0x1e0   :  { %v648_v1 = vrot.slane %v641_v22, 4  ;;  %v643_v26 = vmax.f32 %v637_v25, 0.0  ;;  %v642_v27 = vmax.f32 %v624_v24, 0.0 }
 0x1e2   :  { %v650_v23 = vsel %vm575_vm3, %v640_v21, %v648_v1  ;;  %v649_v28 = vrot.slane %v643_v26, 4 }
 0x1e3   :  { %654 = vst [vmem:[#allocation10] sm:$0xff] %v650_v23  ;;  %v599_v29 = vpop.f32.mrf.mxu2  ;;  %v612_v30 = vpop.f32.mrf.mxu3 }
 0x1e4   :  { %v651_v31 = vsel %vm575_vm3, %v642_v27, %v649_v28 }
 0x1e5   :  { %655 = vst [vmem:[#allocation10 + $0x8] sm:$0xff] %v651_v31  ;;  %v625_v32 = vpop.f32.mrf.mxu0  ;;  %v638_v33 = vpop.f32.mrf.mxu1 }
 0x1e6   :  { %666 = dma.vmem_to_hbm [thread:$0]  %s662_s18, 256, %s664_s21, [#allocation6]  }
 0x1e7   :  { %1006 = dma.done.wait [#allocation6], 256  }
 0x1e8   :  { %1007 = vsyncadd [#allocation6], 4294967040 }
 0x1e9   :  { %671 = vsyncpa [#allocation5], 1 }
 0x1ea   :  { %672 = vsyncpa [#allocation8], 1 }
 0x1eb   :  { %673 = vsyncpa [#allocation6], 1 }

</bundles_post_ra>
